<compile_context>
chip_gen: v7x
topology: tpu7x:2x2x1
jax: 0.10.0
libtpu: 0.0.40
codegen_flags: <defaults>
</compile_context>

<pallas_src>
import jax
import jax.numpy as jnp
import numpy as np
from jax.experimental import pallas as pl
from jax.experimental.pallas import tpu as pltpu


# Rows gathered per grid step == lane width of the fused kernel's output block.
_GATHER_ROWS = 128
# Keep the resident table <= 8 MiB so even a 2x-buffered copy fits the 32 MiB
# scoped-VMEM default on every generation (v7x physical VMEM is only 64 MiB).
_VMEM_TABLE_BYTES = 8 * 1024 * 1024


def _round_up(x, m):
    return ((x + m - 1) // m) * m


def _table_in_vmem(emb_weight, override):
    """Decide whether to keep the embedding table resident in VMEM."""
    if override is not None:
        return bool(override)
    n, d = emb_weight.shape
    nbytes = n * d * emb_weight.dtype.itemsize
    # Only 32-bit tables take the VMEM gather path by default (dynamic sublane
    # gathers of packed dtypes are lowering-risky); bf16 tables use the DMA path.
    return emb_weight.dtype.itemsize == 4 and nbytes <= _VMEM_TABLE_BYTES


# ---------------------------------------------------------------------------
# Kernel 1: batched embedding gather  (ANEDA.forward(nodes) == emb.weight[nodes])
# ---------------------------------------------------------------------------
def _gather_vmem_kernel(idx_ref, emb_ref, out_ref):
    """Table resident in VMEM: gather rows with dynamic VMEM reads."""
    g = out_ref.shape[0]
    base = pl.program_id(0) * g

    @pl.loop(0, g)
    def _copy(r):
        out_ref[pl.ds(r, 1), :] = emb_ref[pl.ds(idx_ref[base + r], 1), :]


def _gather_hbm_kernel(idx_ref, emb_hbm, out_ref, sem):
    """Table in HBM: per-row DMAs straight into the pipelined output block.
    All g copies signal one semaphore; every copy is waited on before the body
    ends (required because the destination is the pipelined out_ref)."""
    g = out_ref.shape[0]
    base = pl.program_id(0) * g

    @pl.loop(0, g)
    def _issue(r):
        row = idx_ref[base + r]
        pltpu.make_async_copy(
            emb_hbm.at[pl.ds(row, 1), :], out_ref.at[pl.ds(r, 1), :], sem.at[0]
        ).start()

    @pl.loop(0, g)
    def _wait(r):
        pltpu.make_async_copy(
            emb_hbm.at[pl.ds(0, 1), :], out_ref.at[pl.ds(r, 1), :], sem.at[0]
        ).wait()


def aneda_forward(emb_weight, nodes=None, *, rows_per_step=_GATHER_ROWS,
                  table_in_vmem=None):
    """Mirror of ANEDA.forward: return full table if nodes is None, else emb[nodes]."""
    if nodes is None:
        return emb_weight
    nodes = nodes.astype(jnp.int32)
    (B,) = nodes.shape
    N, D = emb_weight.shape
    g = rows_per_step
    b_pad = _round_up(max(B, 1), g)
    nodes_p = jnp.pad(nodes, (0, b_pad - B))
    nb = b_pad // g

    if _table_in_vmem(emb_weight, table_in_vmem):
        kernel = _gather_vmem_kernel
        in_specs = [pl.BlockSpec((N, D), lambda i, idx: (0, 0))]  # resident table
        scratch = []
    else:
        kernel = _gather_hbm_kernel
        in_specs = [pl.BlockSpec(memory_space=pl.ANY)]            # table stays in HBM
        scratch = [pltpu.SemaphoreType.DMA((1,))]

    out = pl.pallas_call(
        kernel,
        out_shape=jax.ShapeDtypeStruct((b_pad, D), emb_weight.dtype),
        grid_spec=pltpu.PrefetchScalarGridSpec(
            num_scalar_prefetch=1,
            grid=(nb,),
            in_specs=in_specs,
            out_specs=pl.BlockSpec((g, D), lambda i, idx: (i, 0)),
            scratch_shapes=scratch,
        ),
        compiler_params=pltpu.CompilerParams(dimension_semantics=("parallel",)),
    )(nodes_p, emb_weight)
    return out[:B]


# ---------------------------------------------------------------------------
# Kernel 2 (fused loss-prediction path, measure='norm'):
#   dist_hat[i] = || emb[left[i]] - emb[right[i]] ||_2
# Indices are scalar-prefetched into SMEM; outputs are lane-dense (1, g) rows.
# ---------------------------------------------------------------------------
def _fused_l2_vmem_kernel(left_ref, right_ref, emb_ref, out_ref, lbuf, rbuf):
    """Resident-table variant: gather via dynamic VMEM reads, no DMAs/semaphores."""
    g = out_ref.shape[-1]
    base = pl.program_id(0) * g

    @pl.loop(0, g)
    def _gather(r):
        lbuf[pl.ds(r, 1), :] = emb_ref[pl.ds(left_ref[base + r], 1), :]
        rbuf[pl.ds(r, 1), :] = emb_ref[pl.ds(right_ref[base + r], 1), :]

    # f32 compute regardless of table dtype (VPU diff/mul, XLU lane-reduce, EUP sqrt).
    diff = lbuf[...].astype(jnp.float32) - rbuf[...].astype(jnp.float32)
    dist = jnp.sqrt(jnp.sum(diff * diff, axis=-1))     # (g,)
    out_ref[...] = dist.reshape(out_ref.shape)         # lane-dense (1, g)


def _fused_l2_hbm_kernel(left_ref, right_ref, emb_hbm, out_ref,
                         lbuf, rbuf, lsem, rsem):
    """HBM-table variant, double-buffered across grid steps (P4):
    at step i, issue step i+1's row DMAs into slot (i+1)%2 (SMEM index reads
    happen before any .wait()), then wait on slot i%2 and compute on it."""
    _, g, _ = lbuf.shape
    i = pl.program_id(0)
    nb = pl.num_programs(0)
    slot = i % 2
    nxt = (i + 1) % 2

    def issue(step, s):
        base = step * g

        @pl.loop(0, g)
        def _issue(r):
            li = left_ref[base + r]
            ri = right_ref[base + r]
            pltpu.make_async_copy(
                emb_hbm.at[pl.ds(li, 1), :], lbuf.at[s, pl.ds(r, 1), :], lsem.at[s]
            ).start()
            pltpu.make_async_copy(
                emb_hbm.at[pl.ds(ri, 1), :], rbuf.at[s, pl.ds(r, 1), :], rsem.at[s]
            ).start()

    @pl.when(i == 0)
    def _():                      # prologue: prime slot 0
        issue(0, 0)

    @pl.when(i + 1 < nb)
    def _():                      # prefetch next step's rows into the other slot
        issue(i + 1, nxt)

    # Aggregate semaphores: all g row copies of a (slot, side) signal one sem;
    # g per-row-sized waits consume exactly the signalled total.
    @pl.loop(0, g)
    def _wait(r):
        pltpu.make_async_copy(
            emb_hbm.at[pl.ds(0, 1), :], lbuf.at[slot, pl.ds(r, 1), :], lsem.at[slot]
        ).wait()
        pltpu.make_async_copy(
            emb_hbm.at[pl.ds(0, 1), :], rbuf.at[slot, pl.ds(r, 1), :], rsem.at[slot]
        ).wait()

    diff = lbuf[slot].astype(jnp.float32) - rbuf[slot].astype(jnp.float32)
    dist = jnp.sqrt(jnp.sum(diff * diff, axis=-1))
    out_ref[...] = dist.reshape(out_ref.shape)


def aneda_dist_hat(emb_weight, left_idx, right_idx, *, rows_per_step=_GATHER_ROWS,
                   table_in_vmem=None):
    """Fused gather-pairs + L2 distance (ANEDA.loss prediction path, measure='norm')."""
    left_idx = left_idx.astype(jnp.int32)
    right_idx = right_idx.astype(jnp.int32)
    (B,) = left_idx.shape
    N, D = emb_weight.shape
    g = rows_per_step
    b_pad = _round_up(max(B, 1), g)
    lp = jnp.pad(left_idx, (0, b_pad - B))
    rp = jnp.pad(right_idx, (0, b_pad - B))
    nb = b_pad // g

    if _table_in_vmem(emb_weight, table_in_vmem):
        kernel = _fused_l2_vmem_kernel
        in_specs = [pl.BlockSpec((N, D), lambda i, l, r: (0, 0))]   # resident table
        scratch = [pltpu.VMEM((g, D), emb_weight.dtype),
                   pltpu.VMEM((g, D), emb_weight.dtype)]
        semantics = ("parallel",)
    else:
        kernel = _fused_l2_hbm_kernel
        in_specs = [pl.BlockSpec(memory_space=pl.ANY)]              # table stays in HBM
        scratch = [pltpu.VMEM((2, g, D), emb_weight.dtype),         # left rows, 2 slots
                   pltpu.VMEM((2, g, D), emb_weight.dtype),         # right rows, 2 slots
                   pltpu.SemaphoreType.DMA((2,)),
                   pltpu.SemaphoreType.DMA((2,))]
        # Cross-step slot hand-off => this axis must run sequentially on one core.
        semantics = ("arbitrary",)

    out = pl.pallas_call(
        kernel,
        out_shape=jax.ShapeDtypeStruct((nb, g), jnp.float32),
        grid_spec=pltpu.PrefetchScalarGridSpec(
            num_scalar_prefetch=2,
            grid=(nb,),
            in_specs=in_specs,
            out_specs=pl.BlockSpec((1, g), lambda i, l, r: (i, 0)),
            scratch_shapes=scratch,
        ),
        compiler_params=pltpu.CompilerParams(dimension_semantics=semantics),
    )(lp, rp, emb_weight)
    return out.reshape(-1)[:B]


# ---------------------------------------------------------------------------
# Kernel 3: standalone get_distance(measure='norm', norm=2) over already
# materialized embeddings, tiled over the batch with lane-dense output blocks.
# ---------------------------------------------------------------------------
def _l2_dist_kernel(l_ref, r_ref, o_ref):
    diff = l_ref[...].astype(jnp.float32) - r_ref[...].astype(jnp.float32)
    dist = jnp.sqrt(jnp.sum(diff * diff, axis=-1))
    o_ref[...] = dist.reshape(o_ref.shape)              # lane-dense (1, TB)


def aneda_distance_norm(left_emb, right_emb, *, max_rows_per_block=1024):
    B, D = left_emb.shape
    tb = min(max_rows_per_block, _round_up(max(B, 1), 8))
    b_pad = _round_up(max(B, 1), tb)
    lp = jnp.pad(left_emb, ((0, b_pad - B), (0, 0)))
    rp = jnp.pad(right_emb, ((0, b_pad - B), (0, 0)))
    nb = b_pad // tb

    out = pl.pallas_call(
        _l2_dist_kernel,
        out_shape=jax.ShapeDtypeStruct((nb, tb), jnp.float32),
        grid_spec=pltpu.PrefetchScalarGridSpec(
            num_scalar_prefetch=0,
            grid=(nb,),
            in_specs=[pl.BlockSpec((tb, D), lambda i: (i, 0)),
                      pl.BlockSpec((tb, D), lambda i: (i, 0))],
            out_specs=pl.BlockSpec((1, tb), lambda i: (i, 0)),
        ),
        compiler_params=pltpu.CompilerParams(dimension_semantics=("parallel",)),
    )(lp, rp)
    return out.reshape(-1)[:B]


if __name__ == "__main__":
    key = jax.random.PRNGKey(0)
    k_emb, k_nodes, k_left, k_right, k_dist, k_left2, k_right2 = jax.random.split(key, 7)

    # Deterministic synthetic "module parameters": nn.Embedding(N, D) weight.
    N = 32            # num_nodes
    D = 128           # embedding_dim (lane-friendly)
    B = 8             # batch of lookups / samples
    emb_weight = jax.random.normal(k_emb, (N, D), dtype=jnp.float32)

    # ---- forward(nodes): VMEM-resident table path (default for small f32 tables) ----
    nodes = jax.random.randint(k_nodes, (B,), 0, N, dtype=jnp.int32)
    out = jax.block_until_ready(aneda_forward(emb_weight, nodes))
    assert out.shape == (B, D)
    assert np.allclose(np.asarray(out), np.asarray(emb_weight[nodes]), atol=1e-6)

    # ---- forward(nodes): forced HBM DMA-gather path ----
    out_hbm = jax.block_until_ready(aneda_forward(emb_weight, nodes, table_in_vmem=False))
    assert np.allclose(np.asarray(out_hbm), np.asarray(emb_weight[nodes]), atol=1e-6)

    # ---- forward(None) returns the full table ----
    full = aneda_forward(emb_weight, None)
    assert full.shape == (N, D)

    # ---- fused loss() prediction path (VMEM-resident table) ----
    left_idx = jax.random.randint(k_left, (B,), 0, N, dtype=jnp.int32)
    right_idx = jax.random.randint(k_right, (B,), 0, N, dtype=jnp.int32)
    dist_hat = jax.block_until_ready(aneda_dist_hat(emb_weight, left_idx, right_idx))
    dist_ref = jnp.linalg.norm(emb_weight[left_idx] - emb_weight[right_idx], axis=1)
    assert dist_hat.shape == (B,)
    assert np.allclose(np.asarray(dist_hat), np.asarray(dist_ref), rtol=1e-5, atol=1e-5)

    # ---- multi-block coverage, both paths (HBM path exercises the cross-step
    #      double buffering since nb=2) ----
    B2 = 200
    l2 = jax.random.randint(k_left2, (B2,), 0, N, dtype=jnp.int32)
    r2 = jax.random.randint(k_right2, (B2,), 0, N, dtype=jnp.int32)
    d2_ref = jnp.linalg.norm(emb_weight[l2] - emb_weight[r2], axis=1)
    d2_vmem = jax.block_until_ready(aneda_dist_hat(emb_weight, l2, r2))
    d2_hbm = jax.block_until_ready(aneda_dist_hat(emb_weight, l2, r2, table_in_vmem=False))
    assert np.allclose(np.asarray(d2_vmem), np.asarray(d2_ref), rtol=1e-5, atol=1e-5)
    assert np.allclose(np.asarray(d2_hbm), np.asarray(d2_ref), rtol=1e-5, atol=1e-5)

    # ---- bf16 table (halves gather bytes; f32 compute inside the kernel) ----
    emb_bf16 = emb_weight.astype(jnp.bfloat16)
    d_bf16 = jax.block_until_ready(aneda_dist_hat(emb_bf16, left_idx, right_idx))
    d_bf16_ref = jnp.linalg.norm(emb_bf16[left_idx].astype(jnp.float32)
                                 - emb_bf16[right_idx].astype(jnp.float32), axis=1)
    assert np.allclose(np.asarray(d_bf16), np.asarray(d_bf16_ref), rtol=1e-3, atol=1e-3)

    # ---- standalone distance head on materialized embeddings ----
    dn = jax.block_until_ready(
        aneda_distance_norm(emb_weight[left_idx], emb_weight[right_idx]))
    assert np.allclose(np.asarray(dn), np.asarray(dist_ref), rtol=1e-5, atol=1e-5)

    # ---- MSE loss (plain-JAX glue, mirrors nn.MSELoss(reduction='mean')) ----
    dist_true = jax.random.uniform(k_dist, (B,), dtype=jnp.float32) * 5.0
    loss = jnp.mean((dist_hat - dist_true) ** 2)
    jax.block_until_ready(loss)

    print("KERNEL_OK")
</pallas_src>

<mosaic_0001>
module attributes {stable_mosaic.version = 11 : i64} {
  func.func @_gather_vmem_kernel(%arg0: i32, %arg1: memref<128xi32, #tpu.memory_space<smem>>, %arg2: memref<32x128xf32, #tpu.memory_space<vmem>>, %arg3: memref<128x128xf32, #tpu.memory_space<vmem>>) attributes {dimension_semantics = [#tpu.dimension_semantics<parallel>], iteration_bounds = array<i64: 1>, scalar_prefetch = 1 : i64, scratch_operands = 0 : i64, tpu.core_type = #tpu.core_type<tc>, window_params = [{pipeline_mode = #tpu.pipeline_mode<synchronous>, transform_indices = @transform_0, window_bounds = array<i64: 32, 128>}, {transform_indices = @transform_1, window_bounds = array<i64: 128, 128>}]} {
    %c128_i32 = arith.constant 128 : i32
    %0 = arith.muli %arg0, %c128_i32 : i32
    %c0_i32 = arith.constant 0 : i32
    %c128_i32_0 = arith.constant 128 : i32
    %1 = arith.addi %c0_i32, %c128_i32_0 : i32
    %c1_i32 = arith.constant 1 : i32
    scf.for %arg4 = %c0_i32 to %1 step %c1_i32  : i32 {
      %c1_i32_2 = arith.constant 1 : i32
      %2 = arith.muli %arg4, %c1_i32_2 : i32
      %c0_i32_3 = arith.constant 0 : i32
      %3 = arith.addi %c0_i32_3, %2 : i32
      %4 = arith.addi %0, %3 : i32
      %5 = arith.index_cast %4 : i32 to index
      %6 = memref.load %arg1[%5] : memref<128xi32, #tpu.memory_space<smem>>
      %7 = arith.index_cast %6 : i32 to index
      %c0 = arith.constant 0 : index
      %8 = vector.load %arg2[%7, %c0] : memref<32x128xf32, #tpu.memory_space<vmem>>, vector<1x128xf32>
      %9 = arith.index_cast %3 : i32 to index
      %c0_4 = arith.constant 0 : index
      %10 = vector.load %arg3[%9, %c0_4] : memref<128x128xf32, #tpu.memory_space<vmem>>, vector<1x128xf32>
      tpu.vector_store %arg3[%9, %c0_4], %8 {strides = array<i32>} : memref<128x128xf32, #tpu.memory_space<vmem>>, vector<1x128xf32>,
    }
    %c128_i32_1 = arith.constant 128 : i32
    return
  }
  func.func @transform_0(%arg0: i32, %arg1: memref<128xi32, #tpu.memory_space<smem>>) -> (i32, i32) {
    %c0_i32 = arith.constant 0 : i32
    %c0_i32_0 = arith.constant 0 : i32
    %c0_i32_1 = arith.constant 0 : i32
    return %c0_i32, %c0_i32_0 : i32, i32
  }
  func.func @transform_1(%arg0: i32, %arg1: memref<128xi32, #tpu.memory_space<smem>>) -> (i32, i32) {
    %c0_i32 = arith.constant 0 : i32
    %c0_i32_0 = arith.constant 0 : i32
    return %arg0, %c0_i32 : i32, i32
  }
}

</mosaic_0001>

<bundles_post_ra>
// kernel: tpu_custom_call.1
= control target key start
LH: loop header
LB: loop body
LE: loop exit
PB: predicated region body
PF: predicated region fallthrough
CT: control target
= control target key end

     0   :  { %s208_s0 = inlined_call_operand.hbm [shape: s32[128], index: 0, kind: input, shape index: {}]   ;;  %s209_s1 = inlined_call_operand.hbm [shape: f32[32,128], index: 1, kind: input, shape index: {}]   ;;  %s210_s2 = inlined_call_operand.hbm [shape: f32[128,128], index: 2, kind: output, shape index: {}]  }
   0x1   :  { %s78_s11 = scalar_lea.hbm %s208_s0, 16 }
   0x2   :  { %p79_p0 = scmp.ne.s32.totalorder %s208_s0, %s78_s11  ;;  %p82_p1 = scmp.lt.u32.totalorder %s78_s11, %s208_s0 }
   0x4   :  { %p84_p2 = pnand %p82_p1, %p79_p0 }
   0x6   :  { %87 = shalt.err (!%p84_p2)  }
   0x7   :  { %s146_s16 = smov [#allocation3]  }
   0x8   :  { %8 = dma.hbm_to_smem %s208_s0, 16, %s146_s16, [#allocation2] }
   0x9   :  { %136 = dma.done.wait [#allocation2], 16 }
   0xa   :  { %137 = vsyncadd [#allocation2], 4294967280 }
   0xb   :  { %10 = sfence }
   0xc   :  { %11 = vsyncpa [#allocation5], 0 }
   0xd   :  { %12 = vsyncpa [#allocation6], 0  ;;  %s147_s19 = smov [#allocation4]   ;;  %s88_s23 = scalar_lea.hbm %s209_s1, 512 }
   0xe   :  { %s18_s20 = sshll.u32 %s147_s19, 4  ;;  %p89_p3 = scmp.ne.s32.totalorder %s209_s1, %s88_s23  ;;  %s19_s20 = int_to_ptr.vmem [resolvable:$true] %s18_s20 }
   0xf   :  { %p92_p4 = scmp.lt.u32.totalorder %s88_s23, %s209_s1 }
  0x11   :  { %p94_p5 = pnand %p92_p4, %p89_p3 }
  0x13   :  { %97 = shalt.err (!%p94_p5)
}
  0x14   :  { %s98_s0 = scalar_lea.vmem %s19_s20, 512  ;;  %p103_p7 = scmp.lt.s32.totalorder %s19_s20, %s19_s20 }
  0x15   :  { %p99_p6 = scmp.ne.s32.totalorder %s19_s20, %s98_s0  ;;  %p104_p8 = scmp.lt.s32.totalorder %s98_s0, %s98_s0 }
  0x17   :  { %p105_p9 = por %p104_p8, %p103_p7 }
  0x19   :  { %p106_p10 = pnand %p105_p9, %p99_p6 }
  0x1b   :  { %109 = shalt.err (!%p106_p10)
}
  0x1c   :  { %s148_s28 = smov 128   ;;  %s149_s29 = smov 8  }
  0x1d   :  { %24 = dma.hbm_to_vmem [thread:$0]  %s209_s1, 512, %s19_s20, [#allocation5], %s148_s28, %s148_s28, %s149_s29  }
  0x1e   :  { %138 = dma.done.wait [#allocation5], 512  }
  0x1f   :  { %139 = vsyncadd [#allocation5], 4294966784  ;;  %s142_s4 = smov 0  }
  0x20 LB: > { %s36_s5 = sld [smem:[#allocation3 + %s144_s4]]  ;;  %s39_s7 = scalar_lea.vmem [#allocation7], %s144_s4  ;;  %s144_s4 = sphi %s142_s4, %s34_s4  }
  0x21   : > { %s34_s4 = sadd.s32 1, %s144_s4  }
  0x22   : > { %p31_p11 = scmp.ge.s32.totalorder %s34_s4, 128  }
  0x23   :  { %s150_s8 = smov (%p31_p11), [#allocation7]  }
  0x24   :  { %33 = sbr.rel (!%p31_p11) target bundleno = 32 (0x20), region = 37  ;;  %s46_s9 = sshll.u32 (%p31_p11), %s150_s8, 4  ;;  %s47_s9 = int_to_ptr.vmem [resolvable:$true] %s46_s9 }
  0x25   :  { %s110_s10 = scalar_lea.vmem (%p31_p11), %s47_s9, 2048  ;;  %p115_p13 = scmp.lt.s32.totalorder (%p31_p11), %s47_s9, %s47_s9 }
  0x26   : > { %s37_s6 = scalar_lea.vmem [#allocation4], %s36_s5  ;;  %p111_p12 = scmp.ne.s32.totalorder (%p31_p11), %s47_s9, %s110_s10 }
  0x27   : > { %v38_v0 = vld [vmem:[%s37_s6] sm:$0x1]  ;;  %p116_p0 = scmp.lt.s32.totalorder (%p31_p11), %s110_s10, %s110_s10 }
  0x28   : > { %40 = vst [vmem:[%s39_s7] sm:$0x1] %v38_v0 }
  0x29   :  { %p117_p1 = por (%p31_p11), %p116_p0, %p115_p13 }
  0x2b   :  { %p118_p2 = pnand %p117_p1, %p111_p12 }
  0x2d   :  { %121 = shalt.err (!%p118_p2)
}
  0x2e   :  { %s122_s12 = scalar_lea.hbm %s210_s2, 2048 }
  0x2f   :  { %p123_p3 = scmp.ne.s32.totalorder %s210_s2, %s122_s12  ;;  %p126_p4 = scmp.lt.u32.totalorder %s122_s12, %s210_s2 }
  0x31   :  { %p128_p5 = pnand %p126_p4, %p123_p3 }
  0x33   :  { %131 = shalt.err (!%p128_p5)
}
  0x34   :  { %52 = dma.vmem_to_hbm [thread:$0]  %s47_s9, 2048, %s210_s2, [#allocation6], %s148_s28, %s148_s28, %s149_s29  }
  0x35   :  { %140 = dma.done.wait [#allocation6], 2048  }
  0x36   :  { %141 = vsyncadd [#allocation6], 4294965248 }
  0x37   :  { %56 = vsyncpa [#allocation5], 1 }
  0x38   :  { %57 = vsyncpa [#allocation6], 1 }

</bundles_post_ra>
